<compile_context>
chip_gen: v5e
topology: v5e:2x2
jax: 0.10.0
libtpu: 0.0.40
codegen_flags: <defaults>
</compile_context>

<pallas_src>
import functools

import jax
import jax.numpy as jnp
from jax import lax
from jax.experimental import pallas as pl
from jax.experimental.pallas import tpu as pltpu


# ---------------------------------------------------------------------------
# Stage 1: fused 1x1-conv Q/K/V projection (channels-first, bf16 outputs).
# ---------------------------------------------------------------------------
def _qkv_projection_kernel(x_ref, wq_ref, bq_ref, wk_ref, bk_ref, wv_ref, bv_ref,
                           q_ref, k_ref, v_ref):
    """One (batch, spatial-tile) block: project x (C, tn) -> Q/K/V tiles."""
    x = x_ref[0].astype(jnp.bfloat16)                         # (C, tn)

    def project(w_ref, b_ref):
        y = lax.dot_general(w_ref[...], x, (((1,), (0,)), ((), ())),  # NN, K = C
                            preferred_element_type=jnp.float32)
        return (y + b_ref[...]).astype(jnp.bfloat16)          # (C_out, tn)

    q_ref[0] = project(wq_ref, bq_ref)
    k_ref[0] = project(wk_ref, bk_ref)
    v_ref[0] = project(wv_ref, bv_ref)


# ---------------------------------------------------------------------------
# Stage 2: flash attention in transposed (channels, spatial) layout.
# ---------------------------------------------------------------------------
def _flash_attention_kernel(q_ref, k_ref, v_ref, o_ref,
                            m_scratch, l_scratch, acc_scratch,
                            *, n_valid, block_k, needs_mask):
    ki = pl.program_id(2)
    nk = pl.num_programs(2)

    @pl.when(ki == 0)
    def _init():
        m_scratch[...] = jnp.full_like(m_scratch, -jnp.inf)
        l_scratch[...] = jnp.zeros_like(l_scratch)
        acc_scratch[...] = jnp.zeros_like(acc_scratch)

    q = q_ref[0]                                              # (Cq_pad, tq) bf16
    k = k_ref[0]                                              # (Cq_pad, tk) bf16
    v = v_ref[0]                                              # (C, tk)      bf16

    # Transposed scores: s_t[j, i] = sum_d k[d, j] * q[d, i]   -> (tk, tq) f32
    s_t = lax.dot_general(k, q, (((0,), (0,)), ((), ())),
                          preferred_element_type=jnp.float32)

    if needs_mask:
        # Mask padded kv positions (j >= n_valid) out of the softmax.
        kv_pos = block_k * ki + lax.broadcasted_iota(jnp.int32, s_t.shape, 0)
        s_t = jnp.where(kv_pos < n_valid, s_t, -1e30)

    # Online softmax over the kv axis (axis 0 of the transposed score block).
    m_prev = m_scratch[...]                                   # (1, tq)
    m_new = jnp.maximum(m_prev, jnp.max(s_t, axis=0, keepdims=True))
    alpha = jnp.exp(m_prev - m_new)                           # (1, tq)
    p_t = jnp.exp(s_t - m_new)                                # (tk, tq) f32
    l_scratch[...] = alpha * l_scratch[...] + jnp.sum(p_t, axis=0, keepdims=True)

    # acc[c, i] += sum_j v[c, j] * p_t[j, i]   (C, tq) -- full-width MXU tile.
    pv = lax.dot_general(v, p_t.astype(jnp.bfloat16), (((1,), (0,)), ((), ())),
                         preferred_element_type=jnp.float32)
    acc_scratch[...] = alpha * acc_scratch[...] + pv
    m_scratch[...] = m_new

    @pl.when(ki == nk - 1)
    def _finalize():
        # Exact divide (runs once per query tile) and lane-dense (C, tq) store.
        o_ref[0] = (acc_scratch[...] / l_scratch[...]).astype(o_ref.dtype)


# ---------------------------------------------------------------------------
# Tile selection helpers.
# ---------------------------------------------------------------------------
def _divisor_tile(n_pad, cap):
    """Largest multiple-of-128 divisor of n_pad (itself a multiple of 128) <= cap."""
    cap = max(128, min(int(cap), n_pad))
    t = (cap // 128) * 128
    while n_pad % t != 0:
        t -= 128
    return t


def _choose_attention_tiles(n_pad, batch, c, cq_pad, tile_q, tile_k):
    # Collapse the kv (reduction) axis entirely for modest N; otherwise 2048-wide.
    tk = _divisor_tile(n_pad, tile_k if tile_k is not None else 2048)
    # Large query tiles amortize the ~600-cycle per-grid-step pipeline cost.
    tq = _divisor_tile(n_pad, tile_q if tile_q is not None else 512)
    # v7x megacore: keep at least 2 "parallel" grid units (batch * nq).
    if batch == 1 and n_pad // tq < 2 and n_pad >= 256:
        tq = _divisor_tile(n_pad, n_pad // 2)

    def vmem_bytes(tq_, tk_):
        return (2 * tq_ * tk_ * 4           # s_t / p_t f32 intermediates
                + c * tq_ * 4               # f32 accumulator
                + 2 * 2 * (cq_pad * (tq_ + tk_) + c * tk_)   # dbl-buffered bf16 in
                + 2 * c * tq_ * 4)          # dbl-buffered f32 out

    budget = 20 * 1024 * 1024               # conservative: fits v7x's 64 MiB VMEM
    while vmem_bytes(tq, tk) > budget and (tq > 128 or tk > 128):
        if tk >= tq and tk > 128:
            tk = _divisor_tile(n_pad, tk // 2)
        elif tq > 128:
            tq = _divisor_tile(n_pad, tq // 2)
    return tq, tk


# ---------------------------------------------------------------------------
# Wrapper.
# ---------------------------------------------------------------------------
def cross_attention(x_nchw, wq, bq, wk, bk, wv, bv, *, tile_q=None, tile_k=None):
    """CrossAttention forward.

    x_nchw : (B, C, W, H) float32
    wq, wk : (C//8, C)  1x1-conv weights (C_out, C_in), kernel dims squeezed
    wv     : (C, C)
    bq, bk : (C//8,) ; bv : (C,)
    """
    B, C, W, H = x_nchw.shape
    N = W * H
    Cq = wq.shape[0]
    Cq_pad = ((max(Cq, 1) + 7) // 8) * 8                      # sublane-aligned
    N_pad = ((N + 127) // 128) * 128                          # lane-aligned spatial

    # Channels-first, spatially flattened: pure reshape, no HBM transpose.
    x_flat = x_nchw.reshape(B, C, N)
    if N_pad != N:
        x_flat = jnp.pad(x_flat, ((0, 0), (0, 0), (0, N_pad - N)))

    def _pad_rows(w, b):
        pad = Cq_pad - w.shape[0]
        if pad:
            w = jnp.pad(w, ((0, pad), (0, 0)))
            b = jnp.pad(b, ((0, pad),))
        return w, b

    wq_p, bq_p = _pad_rows(wq, bq)
    wk_p, bk_p = _pad_rows(wk, bk)

    wq_b = wq_p.astype(jnp.bfloat16)                          # (Cq_pad, C)
    wk_b = wk_p.astype(jnp.bfloat16)                          # (Cq_pad, C)
    wv_b = wv.astype(jnp.bfloat16)                            # (C, C)
    bq_c = bq_p.reshape(Cq_pad, 1).astype(jnp.float32)
    bk_c = bk_p.reshape(Cq_pad, 1).astype(jnp.float32)
    bv_c = bv.reshape(C, 1).astype(jnp.float32)

    # ---- Stage 1: Q/K/V projection, one pass over x ----
    tn = _divisor_tile(N_pad, 512)
    q_p, k_p, v_p = pl.pallas_call(
        _qkv_projection_kernel,
        out_shape=(
            jax.ShapeDtypeStruct((B, Cq_pad, N_pad), jnp.bfloat16),
            jax.ShapeDtypeStruct((B, Cq_pad, N_pad), jnp.bfloat16),
            jax.ShapeDtypeStruct((B, C, N_pad), jnp.bfloat16),
        ),
        grid_spec=pltpu.PrefetchScalarGridSpec(
            num_scalar_prefetch=0,
            grid=(B, N_pad // tn),
            in_specs=[
                pl.BlockSpec((1, C, tn), lambda b, n: (b, 0, n)),       # x tile
                pl.BlockSpec((Cq_pad, C), lambda b, n: (0, 0)),         # Wq
                pl.BlockSpec((Cq_pad, 1), lambda b, n: (0, 0)),         # bq
                pl.BlockSpec((Cq_pad, C), lambda b, n: (0, 0)),         # Wk
                pl.BlockSpec((Cq_pad, 1), lambda b, n: (0, 0)),         # bk
                pl.BlockSpec((C, C), lambda b, n: (0, 0)),              # Wv
                pl.BlockSpec((C, 1), lambda b, n: (0, 0)),              # bv
            ],
            out_specs=[
                pl.BlockSpec((1, Cq_pad, tn), lambda b, n: (b, 0, n)),  # Q
                pl.BlockSpec((1, Cq_pad, tn), lambda b, n: (b, 0, n)),  # K
                pl.BlockSpec((1, C, tn), lambda b, n: (b, 0, n)),       # V
            ],
        ),
        compiler_params=pltpu.CompilerParams(
            dimension_semantics=("parallel", "parallel")),
    )(x_flat, wq_b, bq_c, wk_b, bk_c, wv_b, bv_c)

    # ---- Stage 2: flash attention over precomputed Q/K/V ----
    tq, tk = _choose_attention_tiles(N_pad, B, C, Cq_pad, tile_q, tile_k)
    nq, nk = N_pad // tq, N_pad // tk

    kernel = functools.partial(
        _flash_attention_kernel,
        n_valid=N, block_k=tk, needs_mask=(N_pad != N))

    out_flat = pl.pallas_call(
        kernel,
        out_shape=jax.ShapeDtypeStruct((B, C, N_pad), x_nchw.dtype),
        grid_spec=pltpu.PrefetchScalarGridSpec(
            num_scalar_prefetch=0,
            grid=(B, nq, nk),                                   # kv (reduction) last
            in_specs=[
                pl.BlockSpec((1, Cq_pad, tq), lambda b, qi, ki: (b, 0, qi)),  # Q
                pl.BlockSpec((1, Cq_pad, tk), lambda b, qi, ki: (b, 0, ki)),  # K
                pl.BlockSpec((1, C, tk), lambda b, qi, ki: (b, 0, ki)),       # V
            ],
            out_specs=pl.BlockSpec((1, C, tq), lambda b, qi, ki: (b, 0, qi)),
            scratch_shapes=[
                pltpu.VMEM((1, tq), jnp.float32),   # running max
                pltpu.VMEM((1, tq), jnp.float32),   # running denominator
                pltpu.VMEM((C, tq), jnp.float32),   # output accumulator (C, tq)
            ],
        ),
        compiler_params=pltpu.CompilerParams(
            dimension_semantics=("parallel", "parallel", "arbitrary"),
            vmem_limit_bytes=40 * 1024 * 1024),
    )(q_p, k_p, v_p)

    out = out_flat[:, :, :N] if N_pad != N else out_flat
    return out.reshape(B, C, W, H)


# ---------------------------------------------------------------------------
# Pure-JAX f32 reference matching the PyTorch module exactly.
# ---------------------------------------------------------------------------
def reference(x_nchw, wq, bq, wk, bk, wv, bv):
    B, C, W, H = x_nchw.shape
    N = W * H
    x = x_nchw.reshape(B, C, N)
    q = jnp.einsum('oc,bcn->bon', wq, x) + bq[None, :, None]   # (B, Cq, N)
    k = jnp.einsum('oc,bcn->bon', wk, x) + bk[None, :, None]   # (B, Cq, N)
    v = jnp.einsum('oc,bcn->bon', wv, x) + bv[None, :, None]   # (B, C, N)
    attn = jnp.einsum('bdi,bdj->bij', q, k)                    # bmm(q^T, k)
    attn = jax.nn.softmax(attn, axis=-1)
    out = jnp.einsum('bcj,bij->bci', v, attn)                  # bmm(v, attn^T)
    return out.reshape(B, C, W, H)


if __name__ == "__main__":
    B, C, W, H = 2, 32, 16, 16        # in_channels=32 -> query/key channels = 4; N = 256
    Cq = C // 8

    key = jax.random.PRNGKey(0)
    ks = jax.random.split(key, 7)
    x = jax.random.normal(ks[0], (B, C, W, H), dtype=jnp.float32)

    # Conv2d(kernel_size=1) parameters, stored as (C_out, C_in) / (C_out,).
    wq = 0.1 * jax.random.normal(ks[1], (Cq, C), dtype=jnp.float32)
    bq = 0.1 * jax.random.normal(ks[2], (Cq,), dtype=jnp.float32)
    wk = 0.1 * jax.random.normal(ks[3], (Cq, C), dtype=jnp.float32)
    bk = 0.1 * jax.random.normal(ks[4], (Cq,), dtype=jnp.float32)
    wv = 0.1 * jax.random.normal(ks[5], (C, C), dtype=jnp.float32)
    bv = 0.1 * jax.random.normal(ks[6], (C,), dtype=jnp.float32)

    out = cross_attention(x, wq, bq, wk, bk, wv, bv)
    out = jax.block_until_ready(out)

    ref = reference(x, wq, bq, wk, bk, wv, bv)
    assert out.shape == (B, C, W, H)
    max_err = float(jnp.max(jnp.abs(out - ref)))
    # bf16 MXU operands -> loosened tolerance vs the f32 reference.
    assert jnp.allclose(out, ref, atol=5e-2, rtol=5e-2), \
        f"mismatch vs reference (max abs err {max_err})"

    print("KERNEL_OK")
</pallas_src>

<mosaic_0001>
module attributes {stable_mosaic.version = 11 : i64} {
  func.func @_qkv_projection_kernel(%arg0: i32, %arg1: i32, %arg2: memref<1x32x256xf32, #tpu.memory_space<vmem>>, %arg3: memref<8x32xbf16, #tpu.memory_space<vmem>>, %arg4: memref<8x1xf32, #tpu.memory_space<vmem>>, %arg5: memref<8x32xbf16, #tpu.memory_space<vmem>>, %arg6: memref<8x1xf32, #tpu.memory_space<vmem>>, %arg7: memref<32x32xbf16, #tpu.memory_space<vmem>>, %arg8: memref<32x1xf32, #tpu.memory_space<vmem>>, %arg9: memref<1x8x256xbf16, #tpu.memory_space<vmem>>, %arg10: memref<1x8x256xbf16, #tpu.memory_space<vmem>>, %arg11: memref<1x32x256xbf16, #tpu.memory_space<vmem>>) attributes {dimension_semantics = [#tpu.dimension_semantics<parallel>, #tpu.dimension_semantics<parallel>], iteration_bounds = array<i64: 2, 1>, scalar_prefetch = 0 : i64, scratch_operands = 0 : i64, tpu.core_type = #tpu.core_type<tc>, window_params = [{transform_indices = @transform_0, window_bounds = array<i64: 1, 32, 256>}, {pipeline_mode = #tpu.pipeline_mode<synchronous>, transform_indices = @transform_1, window_bounds = array<i64: 8, 32>}, {pipeline_mode = #tpu.pipeline_mode<synchronous>, transform_indices = @transform_2, window_bounds = array<i64: 8, 1>}, {pipeline_mode = #tpu.pipeline_mode<synchronous>, transform_indices = @transform_3, window_bounds = array<i64: 8, 32>}, {pipeline_mode = #tpu.pipeline_mode<synchronous>, transform_indices = @transform_4, window_bounds = array<i64: 8, 1>}, {pipeline_mode = #tpu.pipeline_mode<synchronous>, transform_indices = @transform_5, window_bounds = array<i64: 32, 32>}, {pipeline_mode = #tpu.pipeline_mode<synchronous>, transform_indices = @transform_6, window_bounds = array<i64: 32, 1>}, {transform_indices = @transform_7, window_bounds = array<i64: 1, 8, 256>}, {transform_indices = @transform_8, window_bounds = array<i64: 1, 8, 256>}, {transform_indices = @transform_9, window_bounds = array<i64: 1, 32, 256>}]} {
    %c0 = arith.constant 0 : index
    %c0_0 = arith.constant 0 : index
    %c0_1 = arith.constant 0 : index
    %0 = vector.load %arg2[%c0, %c0_0, %c0_1] : memref<1x32x256xf32, #tpu.memory_space<vmem>>, vector<1x32x256xf32>
    %1 = vector.shape_cast %0 : vector<1x32x256xf32> to vector<32x256xf32>
    %2 = arith.truncf %1 : vector<32x256xf32> to vector<32x256xbf16>
    %c0_2 = arith.constant 0 : index
    %c0_3 = arith.constant 0 : index
    %3 = vector.load %arg3[%c0_2, %c0_3] : memref<8x32xbf16, #tpu.memory_space<vmem>>, vector<8x32xbf16>
    %cst = arith.constant dense<0.000000e+00> : vector<8x256xf32>
    %4 = tpu.matmul %3, %2, %cst {dimension_numbers = #tpu.dot_dimension_numbers<[1], [0], [0], [1], [0, 0, 1, 1], [], []>} : vector<8x32xbf16>, vector<32x256xbf16>, vector<8x256xf32> -> vector<8x256xf32>
    %c0_4 = arith.constant 0 : index
    %c0_5 = arith.constant 0 : index
    %5 = vector.load %arg4[%c0_4, %c0_5] : memref<8x1xf32, #tpu.memory_space<vmem>>, vector<8x1xf32>
    %6 = vector.broadcast %5 : vector<8x1xf32> to vector<8x256xf32>
    %7 = arith.addf %4, %6 : vector<8x256xf32>
    %8 = arith.truncf %7 : vector<8x256xf32> to vector<8x256xbf16>
    %c0_6 = arith.constant 0 : index
    %c0_7 = arith.constant 0 : index
    %c0_8 = arith.constant 0 : index
    %9 = vector.load %arg9[%c0_6, %c0_7, %c0_8] : memref<1x8x256xbf16, #tpu.memory_space<vmem>>, vector<1x8x256xbf16>
    %10 = vector.shape_cast %9 : vector<1x8x256xbf16> to vector<8x256xbf16>
    %11 = vector.shape_cast %8 : vector<8x256xbf16> to vector<1x8x256xbf16>
    tpu.vector_store %arg9[%c0_6, %c0_7, %c0_8], %11 {strides = array<i32>} : memref<1x8x256xbf16, #tpu.memory_space<vmem>>, vector<1x8x256xbf16>,
    %c0_9 = arith.constant 0 : index
    %c0_10 = arith.constant 0 : index
    %12 = vector.load %arg5[%c0_9, %c0_10] : memref<8x32xbf16, #tpu.memory_space<vmem>>, vector<8x32xbf16>
    %cst_11 = arith.constant dense<0.000000e+00> : vector<8x256xf32>
    %13 = tpu.matmul %12, %2, %cst_11 {dimension_numbers = #tpu.dot_dimension_numbers<[1], [0], [0], [1], [0, 0, 1, 1], [], []>} : vector<8x32xbf16>, vector<32x256xbf16>, vector<8x256xf32> -> vector<8x256xf32>
    %c0_12 = arith.constant 0 : index
    %c0_13 = arith.constant 0 : index
    %14 = vector.load %arg6[%c0_12, %c0_13] : memref<8x1xf32, #tpu.memory_space<vmem>>, vector<8x1xf32>
    %15 = vector.broadcast %14 : vector<8x1xf32> to vector<8x256xf32>
    %16 = arith.addf %13, %15 : vector<8x256xf32>
    %17 = arith.truncf %16 : vector<8x256xf32> to vector<8x256xbf16>
    %c0_14 = arith.constant 0 : index
    %c0_15 = arith.constant 0 : index
    %c0_16 = arith.constant 0 : index
    %18 = vector.load %arg10[%c0_14, %c0_15, %c0_16] : memref<1x8x256xbf16, #tpu.memory_space<vmem>>, vector<1x8x256xbf16>
    %19 = vector.shape_cast %18 : vector<1x8x256xbf16> to vector<8x256xbf16>
    %20 = vector.shape_cast %17 : vector<8x256xbf16> to vector<1x8x256xbf16>
    tpu.vector_store %arg10[%c0_14, %c0_15, %c0_16], %20 {strides = array<i32>} : memref<1x8x256xbf16, #tpu.memory_space<vmem>>, vector<1x8x256xbf16>,
    %c0_17 = arith.constant 0 : index
    %c0_18 = arith.constant 0 : index
    %21 = vector.load %arg7[%c0_17, %c0_18] : memref<32x32xbf16, #tpu.memory_space<vmem>>, vector<32x32xbf16>
    %cst_19 = arith.constant dense<0.000000e+00> : vector<32x256xf32>
    %22 = tpu.matmul %21, %2, %cst_19 {dimension_numbers = #tpu.dot_dimension_numbers<[1], [0], [0], [1], [0, 0, 1, 1], [], []>} : vector<32x32xbf16>, vector<32x256xbf16>, vector<32x256xf32> -> vector<32x256xf32>
    %c0_20 = arith.constant 0 : index
    %c0_21 = arith.constant 0 : index
    %23 = vector.load %arg8[%c0_20, %c0_21] : memref<32x1xf32, #tpu.memory_space<vmem>>, vector<32x1xf32>
    %24 = vector.broadcast %23 : vector<32x1xf32> to vector<32x256xf32>
    %25 = arith.addf %22, %24 : vector<32x256xf32>
    %26 = arith.truncf %25 : vector<32x256xf32> to vector<32x256xbf16>
    %c0_22 = arith.constant 0 : index
    %c0_23 = arith.constant 0 : index
    %c0_24 = arith.constant 0 : index
    %27 = vector.load %arg11[%c0_22, %c0_23, %c0_24] : memref<1x32x256xbf16, #tpu.memory_space<vmem>>, vector<1x32x256xbf16>
    %28 = vector.shape_cast %27 : vector<1x32x256xbf16> to vector<32x256xbf16>
    %29 = vector.shape_cast %26 : vector<32x256xbf16> to vector<1x32x256xbf16>
    tpu.vector_store %arg11[%c0_22, %c0_23, %c0_24], %29 {strides = array<i32>} : memref<1x32x256xbf16, #tpu.memory_space<vmem>>, vector<1x32x256xbf16>,
    return
  }
  func.func @transform_0(%arg0: i32, %arg1: i32) -> (i32, i32, i32) {
    %c0_i32 = arith.constant 0 : i32
    %c0_i32_0 = arith.constant 0 : i32
    return %arg0, %c0_i32, %arg1 : i32, i32, i32
  }
  func.func @transform_1(%arg0: i32, %arg1: i32) -> (i32, i32) {
    %c0_i32 = arith.constant 0 : i32
    %c0_i32_0 = arith.constant 0 : i32
    %c0_i32_1 = arith.constant 0 : i32
    return %c0_i32, %c0_i32_0 : i32, i32
  }
  func.func @transform_2(%arg0: i32, %arg1: i32) -> (i32, i32) {
    %c0_i32 = arith.constant 0 : i32
    %c0_i32_0 = arith.constant 0 : i32
    %c0_i32_1 = arith.constant 0 : i32
    return %c0_i32, %c0_i32_0 : i32, i32
  }
  func.func @transform_3(%arg0: i32, %arg1: i32) -> (i32, i32) {
    %c0_i32 = arith.constant 0 : i32
    %c0_i32_0 = arith.constant 0 : i32
    %c0_i32_1 = arith.constant 0 : i32
    return %c0_i32, %c0_i32_0 : i32, i32
  }
  func.func @transform_4(%arg0: i32, %arg1: i32) -> (i32, i32) {
    %c0_i32 = arith.constant 0 : i32
    %c0_i32_0 = arith.constant 0 : i32
    %c0_i32_1 = arith.constant 0 : i32
    return %c0_i32, %c0_i32_0 : i32, i32
  }
  func.func @transform_5(%arg0: i32, %arg1: i32) -> (i32, i32) {
    %c0_i32 = arith.constant 0 : i32
    %c0_i32_0 = arith.constant 0 : i32
    %c0_i32_1 = arith.constant 0 : i32
    return %c0_i32, %c0_i32_0 : i32, i32
  }
  func.func @transform_6(%arg0: i32, %arg1: i32) -> (i32, i32) {
    %c0_i32 = arith.constant 0 : i32
    %c0_i32_0 = arith.constant 0 : i32
    %c0_i32_1 = arith.constant 0 : i32
    return %c0_i32, %c0_i32_0 : i32, i32
  }
  func.func @transform_7(%arg0: i32, %arg1: i32) -> (i32, i32, i32) {
    %c0_i32 = arith.constant 0 : i32
    %c0_i32_0 = arith.constant 0 : i32
    return %arg0, %c0_i32, %arg1 : i32, i32, i32
  }
  func.func @transform_8(%arg0: i32, %arg1: i32) -> (i32, i32, i32) {
    %c0_i32 = arith.constant 0 : i32
    %c0_i32_0 = arith.constant 0 : i32
    return %arg0, %c0_i32, %arg1 : i32, i32, i32
  }
  func.func @transform_9(%arg0: i32, %arg1: i32) -> (i32, i32, i32) {
    %c0_i32 = arith.constant 0 : i32
    %c0_i32_0 = arith.constant 0 : i32
    return %arg0, %c0_i32, %arg1 : i32, i32, i32
  }
}

</mosaic_0001>

<bundles_post_ra>
// kernel: tpu_custom_call.1
= control target key start
LH: loop header
LB: loop body
LE: loop exit
PB: predicated region body
PF: predicated region fallthrough
CT: control target
= control target key end

     0   :  { %s1375_s0 = inlined_call_operand.hbm [shape: f32[2,32,256], index: 0, kind: input, shape index: {}]   ;;  %s1376_s1 = inlined_call_operand.vmem [shape: bf16[8,32], index: 1, kind: input, shape index: {}]   ;;  %s1377_s2 = inlined_call_operand.vmem [shape: f32[8,1], index: 2, kind: input, shape index: {}]   ;;  %s1378_s3 = inlined_call_operand.vmem [shape: bf16[8,32], index: 3, kind: input, shape index: {}]   ;;  %s1379_s4 = inlined_call_operand.vmem [shape: f32[8,1], index: 4, kind: input, shape index: {}]   ;;  %s1380_s5 = inlined_call_operand.vmem [shape: bf16[32,32], index: 5, kind: input, shape index: {}]   ;;  %s1381_s6 = inlined_call_operand.vmem [shape: f32[32,1], index: 6, kind: input, shape index: {}]   ;;  %s1382_s7 = inlined_call_operand.hbm [shape: bf16[2,8,256], index: 7, kind: output, shape index: {0}]   ;;  %s1383_s8 = inlined_call_operand.hbm [shape: bf16[2,8,256], index: 8, kind: output, shape index: {1}]   ;;  %s1384_s9 = inlined_call_operand.hbm [shape: bf16[2,32,256], index: 9, kind: output, shape index: {2}]  }
   0x1   :  { %1390 = sst [smem:[#allocation16_spill]] %s1375_s0 }
   0x2   :  { %1391 = sst [smem:[#allocation17_spill]] %s1376_s1 }
   0x3   :  { %1392 = sst [smem:[#allocation18_spill]] %s1384_s9 }
   0x4   :  { %15 = vsyncpa [#allocation3], 0 }
   0x5   :  { %17 = vsyncpa [#allocation3 + $0x1], 0 }
   0x6   :  { %18 = vsyncpa [#allocation4], 0 }
   0x7   :  { %20 = vsyncpa [#allocation4 + $0x1], 0 }
   0x8   :  { %21 = vsyncpa [#allocation7], 0 }
   0x9   :  { %23 = vsyncpa [#allocation7 + $0x1], 0  ;;  %s1149_s30 = smov 0   ;;  %s1151_s10 = smov 0  }
   0xa   :  { %s1153_s11 = smov 0   ;;  %s1155_s12 = smov 0  }
   0xb   :  { %s1157_s13 = smov 0   ;;  %s1159_s14 = smov 0  }
   0xc LB: > { %1393 = sst [smem:[#allocation12_spill]] %s1072_s30  ;;  %s1180_s15 = sadd.s32 4294967295, %s1092_s14   ;;  %s1092_s14 = sphi %s1159_s14, %s29_s14   ;;  %s1088_s13 = sphi %s1157_s13, %s1408_s13   ;;  %s1084_s12 = sphi %s1155_s12, %s1407_s12   ;;  %s1080_s11 = sphi %s1153_s11, %s1411_s11   ;;  %s1076_s10 = sphi %s1151_s10, %s1410_s10   ;;  %s1072_s30 = sphi %s1149_s30, %s1409_s30  }
   0xd   : > { %1394 = sst [smem:[#allocation13_spill]] %s1088_s13  ;;  %s1388_s16 = sadd.s32 4294967294, %s1092_s14  }
   0xe   : > { %s41_s17 = sadd.s32 1, %s1088_s13  ;;  %s50_s18 = sadd.s32 1, %s1080_s11 }
   0xf   : > { %p43_p0 = scmp.ge.s32.totalorder %s41_s17, 2  ;;  %p57_p1 = scmp.ne.s32.totalorder %s1080_s11, %s1076_s10 }
  0x10   : > { %p58_p2 = scmp.eq.s32.totalorder %s1092_s14, 0  ;;  %p63_p3 = scmp.ne.s32.totalorder %s1076_s10, %s1072_s30 }
  0x11   : > { %s1413_s17 = smov (%p43_p0, %s41_s17), 0  ;;  %p64_p5 = scmp.eq.s32.totalorder %s1180_s15, 0 }
  0x12   : > { %1395 = sst [smem:[#allocation14_spill]] %s1413_s17  ;;  %p1192_p4 = por %p58_p2, %p57_p1 }
  0x13   : > { %s45_s20 = ssub.s32 %s1088_s13, %s1413_s17  ;;  %p215_p6 = scmp.eq.s32.totalorder %s1180_s15, 1 }
  0x14   : > { %p48_p7 = scmp.eq.s32.totalorder %s45_s20, 0  ;;  %p1200_p8 = por %p64_p5, %p63_p3 }
  0x15   : > { %p1204_p9 = por %p215_p6, %p57_p1  ;;  %p221_p10 = scmp.eq.s32.totalorder %s1388_s16, 1 }
  0x16   : > { %s1211_s23 = scalar_select %p48_p7, %s1080_s11, %s50_s18  }
  0x17   : > { %p1213_p11 = por %p221_p10, %p63_p3  ;;  %p798_p12 = scmp.ge.s32.totalorder %s1092_s14, 2 }
  0x18   : > { %1399 = sst [smem:[#allocation15_spill]] %s1211_s23  ;;  %p862_p13 = scmp.lt.s32.totalorder %s1092_s14, 2 }
  0x19   : > { %s315_s25 = sand.u32 1, %s1080_s11   ;;  %s834_s27 = sshll.u32 %s1088_s13, 6 }
  0x1a   : > { %s799_s26 = sshll.u32 %s315_s25, 6  ;;  %s1401_s0 = sld [smem:[#allocation16_spill]] }
  0x1b   : > { %s319_s17 = scalar_lea.vmem [#allocation2], %s799_s26  ;;  %p849_p0 = pnand %p862_p13, %p1192_p4 }
  0x1c   : > { %s329_s30 = sshll.u32 %s319_s17, 4  ;;  %p802_p1 = scmp.ge.s32.totalorder %s1092_s14, 1  ;;  %s330_s30 = int_to_ptr.vmem [resolvable:$true] %s329_s30 }
  0x1d   : > { %s316_s18 = scalar_lea.sflag [#allocation3], %s315_s25  ;;  %s1094_s16 = smov 256  }
  0x1e   : > { %s1095_s23 = smov 16   ;;  %p337_p2 = scmp.lt.s32.totalorder %s1092_s14, 3 }
  0x20   : > { %s326_s20 = scalar_lea.hbm %s1401_s0, %s834_s27  ;;  %p338_p3 = pnand %p802_p1, %p337_p2 }
  0x21   : > { %s327_s9 = sshll.u32 %s326_s20, 4  ;;  %s1229_s13 = sand.u32 (!%p338_p3), 1, %s1076_s10   ;;  %s328_s9 = int_to_ptr.hbm [resolvable:$true] %s327_s9 }
  0x22   : > { %851 = dma.hbm_to_vmem [thread:$0]  (!%p849_p0), %s328_s9, 1024, %s330_s30, %s316_s18, %s1094_s16, %s1094_s16, %s1095_s23  }
  0x23   : > { %341 = sbr.rel (%p338_p3) target bundleno = 221 (0xdd), region = 48  ;;  %s803_s17 = sshll.u32 (!%p338_p3), %s1229_s13, 6 }
  0x24   : > { %s344_s26 = scalar_lea.sflag (!%p338_p3), [#allocation3], %s1229_s13  ;;  %s347_s27 = scalar_lea.vmem (!%p338_p3), [#allocation2], %s803_s17 }
  0x28   : > { %1059 = dma.done.wait (%p1200_p8), %s344_s26, 1024  }
  0x29   : > { %1061 = vsyncadd (%p1200_p8), %s344_s26, 4294966272  ;;  %v1096_v0 = vmov 0   ;;  %v402_v1 = vld [vmem:[%s347_s27 + $0x20] sm:$0xff]  ;;  %v404_v2 = vld [vmem:[%s347_s27 + $0x30] sm:$0xff]  ;;  %s1402_s1 = sld [smem:[#allocation17_spill]]  ;;  %vm417_vm0 = vcmask 261120  }
  0x2a   : > { %917 = vset.pattern.permute.xlu0 %v1096_v0  ;;  %918 = vset.pattern.permute.xlu1 %v1096_v0  ;;  %v403_v3 = vld [vmem:[%s347_s27 + $0x28] sm:$0xff]  ;;  %v408_v4 = vpack.c.bf16 %v404_v2, %v402_v1  ;;  %v405_v5 = vld [vmem:[%s347_s27 + $0x38] sm:$0xff]  ;;  %v398_v6 = vld [vmem:[%s347_s27] sm:$0xff]  ;;  %s806_s25 = sshll.u32 %s1229_s13, 5  ;;  %s837_s28 = sshll.u32 %s1084_s12, 3 }
  0x2b   : > { %919 = vset.pattern.permute.xlu2 %v1096_v0  ;;  %v400_v7 = vld [vmem:[%s347_s27 + $0x10] sm:$0xff]  ;;  %v409_v8 = vpack.c.bf16 %v405_v5, %v403_v3  ;;  %v399_v9 = vld [vmem:[%s347_s27 + $0x8] sm:$0xff]  ;;  %v401_v10 = vld [vmem:[%s347_s27 + $0x18] sm:$0xff]  ;;  %s804_s29 = sshll.u32 %s1229_s13, 3  ;;  %s601_s17 = scalar_lea.hbm %s1382_s7, %s837_s28 }
  0x2c   : > { %427 = vmatpush.bf16.msra.mxu2 %v408_v4  ;;  %537 = vmatpush.bf16.msra.mxu0 %v408_v4  ;;  %v406_v11 = vpack.c.bf16 %v400_v7, %v398_v6  ;;  %v450_v12 = vld [vmem:[%s1379_s4] sm:$0xff]  ;;  %v407_v14 = vpack.c.bf16 %v401_v10, %v399_v9  ;;  %v493_v15 = vld [vmem:[%s1381_s6 + $0x10] sm:$0xff]  ;;  %v492_v19 = vld [vmem:[%s1381_s6 + $0x8] sm:$0xff]  ;;  %s1285_s26 = scalar_lea.vmem [#allocation8], %s806_s25  ;;  %s378_s27 = scalar_lea.vmem [#allocation5], %s804_s29 }
  0x2d   : > { %v491_v13 = vld [vmem:[%s1381_s6] sm:$0xff]  ;;  %440 = vmatpush.bf16.msra.mxu3 %v409_v8  ;;  %556 = vmatpush.bf16.msra.mxu1 %v409_v8  ;;  %v494_v20 = vld [vmem:[%s1381_s6 + $0x18] sm:$0xff]  ;;  %v836_v21 = vld [vmem:[%s1380_s5 + $0x8] sm:$0xff]  ;;  %s603_s9 = sshll.u32 %s378_s27, 4  ;;  %s605_s30 = sshll.u32 %s601_s17, 4  ;;  %s604_s9 = int_to_ptr.vmem [resolvable:$true] %s603_s9  ;;  %s606_s30 = int_to_ptr.hbm [resolvable:$true] %s605_s30 }
  0x2e   : > { %453 = vperm.xlu0 %917, %v450_v12   ;;  %497 = vperm.xlu1 %918, %v491_v13   ;;  %v835_v16 = vld [vmem:[%s1380_s5] sm:$0xff]  ;;  %s578_s16 = scalar_lea.sflag [#allocation4], %s1229_s13  ;;  %s964_s19 = sshra.s32 %s606_s30, 4  ;;  %s965_s19 = int_to_ptr.hbm [resolvable:$true] %s964_s19 }
  0x2f   : > { %507 = vperm.xlu2 %919, %v493_v15   ;;  %v410_v17 = vld [vmem:[%s1402_s1] sm:$0xf]  ;;  %s966_s21 = scalar_lea.hbm %s965_s19, 8  ;;  %s970_s20 = scalar_lea.hbm %s1382_s7, 16 }
  0x30   : > { %428 = vmatpush.bf16.msra.mxu2 %v406_v11  ;;  %538 = vmatpush.bf16.msra.mxu0 %v406_v11  ;;  %v411_v18 = vld [vmem:[%s1377_s2] sm:$0xff]  ;;  %p967_p4 = scmp.ne.s32.totalorder %s965_s19, %s966_s21  ;;  %p971_p7 = scmp.lt.s32.totalorder %s965_s19, %s1382_s7 }
  0x31   : > { %441 = vmatpush.bf16.msra.mxu3 %v407_v14  ;;  %557 = vmatpush.bf16.msra.mxu1 %v407_v14  ;;  %v449_v22 = vld [vmem:[%s1378_s3] sm:$0xf]  ;;  %p972_p8 = scmp.lt.s32.totalorder %s970_s20, %s966_s21 }
  0x32   : > { %p968_p5 = pnand %p967_p4, %p1204_p9 }
  0x33   : > { %807 = vmatmul.msk.bf16.vlgmr.msra.gmra.mxu2 %vm417_vm0, %v410_v17  ;;  %819 = vmatmul.msk.bf16.vlgmr.msra.gmra.mxu0 %vm417_vm0, %v835_v16  ;;  %p973_p10 = por %p972_p8, %p971_p7 }
  0x34   : > { %465 = vmatpush.bf16.msrb.mxu2 %v408_v4  ;;  %808 = vmatmul.msk.bf16.vlgmr.msra.gmra.mxu3 %vm417_vm0, %v410_v17  ;;  %p969_p6 = pneg %p968_p5 }
  0x35   : > { %478 = vmatpush.bf16.msrb.mxu3 %v409_v8  ;;  %821 = vmatmul.msk.bf16.vlgmr.msra.gmra.mxu1 %vm417_vm0, %v835_v16 }
  0x36   : > { %414 = vperm.xlu0 %917, %v411_v18   ;;  %502 = vperm.xlu1 %918, %v492_v19   ;;  %p974_p13 = pnand %p973_p10, %p969_p6 }
  0x37   : > { %512 = vperm.xlu2 %919, %v494_v20  }
  0x38   : > { %466 = vmatpush.bf16.msrb.mxu2 %v406_v11 }
  0x39   : > { %479 = vmatpush.bf16.msrb.mxu3 %v407_v14 }
  0x43   : > { %809 = vmatmul.msk.bf16.vlgmr.msrb.gmra.mxu2 %vm417_vm0, %v449_v22  ;;  %820 = vmatmul.msk.bf16.gmra.mxu0 %vm417_vm0, %v836_v21 }
  0x44   : > { %810 = vmatmul.msk.bf16.vlgmr.msrb.gmra.mxu3 %vm417_vm0, %v449_v22 }
  0x45   : > { %822 = vmatmul.msk.bf16.gmra.mxu1 %vm417_vm0, %v836_v21 }
  0xa0   : > { %v1275_v23 = vpop.permute.xlu0 %453  ;;  %v498_v24 = vpop.permute.xlu1 %497 }
  0xa8   : > { %v415_v30 = vpop.permute.xlu0 %414  ;;  %v503_v32 = vpop.permute.xlu1 %502 }
  0xb0   : > { %v540_v25 = vpop.f32.mrf.mxu0 }
  0xb1   : > { %v541_v26 = vadd.f32 %v540_v25, %v498_v24 }
  0xb2   : > { %v559_v27 = vpop.f32.mrf.mxu1 }
  0xb3   : > { %v560_v28 = vadd.f32 %v559_v27, %v498_v24 }
  0xb5   : > { %v569_v29 = vpack.c.bf16 %v560_v28, %v541_v26 }
  0xb6   : > { %v430_v31 = vpop.f32.mrf.mxu2 }
  0xb7   : > { %573 = vst [vmem:[%s1285_s26] sm:$0xff] %v569_v29  ;;  %v431_v33 = vadd.f32 %v430_v31, %v415_v30  ;;  %v443_v34 = vpop.f32.mrf.mxu3 }
  0xb8   : > { %v444_v35 = vadd.f32 %v443_v34, %v415_v30  ;;  %v542_v36 = vpop.f32.mrf.mxu0 }
  0xb9   : > { %v543_v37 = vadd.f32 %v542_v36, %v503_v32 }
  0xba   : > { %v561_v38 = vpop.f32.mrf.mxu1  ;;  %v447_v39 = vpack.c.bf16 %v444_v35, %v431_v33 }
  0xbb   : > { %v562_v40 = vadd.f32 %v561_v38, %v503_v32 }
  0xbc   : > { %448 = vst [vmem:[%s378_s27] sm:$0xff] %v447_v39 }
  0xbd   : > { %v570_v41 = vpack.c.bf16 %v562_v40, %v543_v37 }
  0xbe   : > { %977 = shalt.err (!%p974_p13)
}
  0xbf   : > { %842 = dma.vmem_to_hbm [thread:$0]  (%p1204_p9), %s604_s9, 128, %s606_s30, %s578_s16   ;;  %v508_v42 = vpop.permute.xlu2 %507  ;;  %574 = vst [vmem:[%s1285_s26 + $0x8] sm:$0xff] %v570_v41  ;;  %v432_v43 = vpop.f32.mrf.mxu2 }
  0xc0   : > { %v445_v44 = vpop.f32.mrf.mxu3  ;;  %v545_v45 = vpop.f32.mrf.mxu0  ;;  %s839_s27 = sshll.u32 %s1084_s12, 5  ;;  %s618_s23 = scalar_lea.hbm %s1383_s8, %s837_s28 }
  0xc1   : > { %v546_v46 = vadd.f32 %v545_v45, %v508_v42  ;;  %s582_s9 = sand.u32 1, %s1180_s15   ;;  %s1403_s25 = sld [smem:[#allocation18_spill]] }
  0xc2   : > { %v564_v47 = vpop.f32.mrf.mxu1  ;;  %s385_s18 = scalar_lea.vmem [#allocation6], %s804_s29  ;;  %s622_s0 = sshll.u32 %s618_s23, 4  ;;  %s623_s0 = int_to_ptr.hbm [resolvable:$true] %s622_s0 }
  0xc3   : > { %v565_v48 = vadd.f32 %v564_v47, %v508_v42  ;;  %s620_s17 = sshll.u32 %s385_s18, 4  ;;  %s636_s1 = sshll.u32 %s1285_s26, 4  ;;  %s621_s17 = int_to_ptr.vmem [resolvable:$true] %s620_s17  ;;  %s1318_s1 = int_to_ptr.vmem [resolvable:$true] %s636_s1 }
  0xc4   : > { %s1322_s13 = scalar_lea.sflag [#allocation7], %s582_s9  ;;  %s992_s15 = sshra.s32 %s623_s0, 4  ;;  %s993_s15 = int_to_ptr.hbm [resolvable:$true] %s992_s15 }
  0xc5   : > { %v571_v49 = vpack.c.bf16 %v565_v48, %v546_v46  ;;  %s994_s28 = scalar_lea.hbm %s993_s15, 8  ;;  %s998_s19 = scalar_lea.hbm %s1383_s8, 16 }
  0xc6   : > { %p995_p0 = scmp.ne.s32.totalorder %s993_s15, %s994_s28  ;;  %p999_p3 = scmp.lt.s32.totalorder %s993_s15, %s1383_s8 }
  0xc7   : > { %575 = vst [vmem:[%s1285_s26 + $0x10] sm:$0xff] %v571_v49  ;;  %v468_v50 = vpop.f32.mrf.mxu2  ;;  %s635_s20 = scalar_lea.hbm %s1403_s25, %s839_s27  ;;  %v513_v53 = vpop.permute.xlu2 %512  ;;  %p1000_p4 = scmp.lt.s32.totalorder %s998_s19, %s994_s28 }
  0xc8   : > { %v469_v51 = vadd.f32 %v468_v50, %v1275_v23  ;;  %v481_v52 = vpop.f32.mrf.mxu3  ;;  %v547_v55 = vpop.f32.mrf.mxu0  ;;  %s638_s12 = sshll.u32 %s635_s20, 4  ;;  %p996_p1 = pnand %p995_p0, %p1204_p9  ;;  %s1320_s12 = int_to_ptr.hbm [resolvable:$true] %s638_s12 }
  0xc9   : > { %v482_v54 = vadd.f32 %v481_v52, %v1275_v23  ;;  %v548_v56 = vadd.f32 %v547_v55, %v513_v53  ;;  %p1001_p5 = por %p1000_p4, %p999_p3 }
  0xca   : > { %v566_v57 = vpop.f32.mrf.mxu1  ;;  %p997_p2 = pneg %p996_p1 }
  0xcb   : > { %v485_v58 = vpack.c.bf16 %v482_v54, %v469_v51  ;;  %v567_v59 = vadd.f32 %v566_v57, %v513_v53 }
  0xcc   : > { %p1002_p6 = pnand %p1001_p5, %p997_p2 }
  0xcd   : > { %v572_v60 = vpack.c.bf16 %v567_v59, %v548_v56  ;;  %486 = vst [vmem:[%s385_s18] sm:$0xff] %v485_v58 }
  0xce   : > { %1005 = shalt.err (!%p1002_p6)
}
  0xcf   : > { %843 = dma.vmem_to_hbm [thread:$0]  (%p1204_p9), %s621_s17, 128, %s623_s0, %s1322_s13   ;;  %576 = vst [vmem:[%s1285_s26 + $0x18] sm:$0xff] %v572_v60  ;;  %v470_v61 = vpop.f32.mrf.mxu2 }
  0xd0   : > { %v483_v62 = vpop.f32.mrf.mxu3  ;;  %s1020_s9 = sshra.s32 %s1320_s12, 4  ;;  %s1026_s18 = scalar_lea.hbm %s1403_s25, 64  ;;  %s1021_s9 = int_to_ptr.hbm [resolvable:$true] %s1020_s9 }
  0xd1   : > { %s1022_s30 = scalar_lea.hbm %s1021_s9, 32  ;;  %p1027_p13 = scmp.lt.s32.totalorder %s1021_s9, %s1403_s25 }
  0xd2   : > { %p1023_p7 = scmp.ne.s32.totalorder %s1021_s9, %s1022_s30  ;;  %p1028_p0 = scmp.lt.s32.totalorder %s1026_s18, %s1022_s30 }
  0xd4   : > { %p1024_p8 = pnand %p1023_p7, %p1204_p9  ;;  %p1029_p1 = por %p1028_p0, %p1027_p13 }
  0xd6   : > { %p1025_p10 = pneg %p1024_p8 }
  0xd8   : > { %p1030_p2 = pnand %p1029_p1, %p1025_p10 }
  0xda   : > { %1033 = shalt.err (!%p1030_p2)
}
  0xdb   : > { %s1097_s0 = smov 128   ;;  %s1098_s26 = smov 8  }
  0xdc   : > { %844 = dma.vmem_to_hbm [thread:$0]  (%p1204_p9), %s1318_s1, 512, %s1320_s12, %s1322_s13, %s1097_s0, %s1097_s0, %s1098_s26  }
  0xdd PF: > { %s1404_s17 = sld [smem:[#allocation12_spill]]  ;;  %p853_p3 = pnand %p798_p12, %p1213_p11 }
  0xdf   : > { %p854_p4 = pneg %p853_p3 }
  0xe3   : > { %s653_s29 = sand.u32 1, %s1404_s17  }
  0xe4   : > { %s654_s27 = scalar_lea.sflag [#allocation4], %s653_s29 }
  0xe5   : > { %1063 = dma.done.wait (%p854_p4), %s654_s27, 128  }
  0xe6   : > { %1065 = vsyncadd (%p854_p4), %s654_s27, 4294967168  ;;  %s1405_s19 = sadd.s32 4294967294, %s1092_s14  }
  0xe7   : > { %s663_s21 = sand.u32 1, %s1405_s19  }
  0xe8   : > { %s664_s23 = scalar_lea.sflag [#allocation7], %s663_s21 }
  0xe9   : > { %1067 = dma.done.wait (%p854_p4), %s664_s23, 640  }
  0xea   : > { %1069 = vsyncadd (%p854_p4), %s664_s23, 4294966656  ;;  %s29_s14 = sadd.s32 1, %s1092_s14   ;;  %s1406_s1 = sld [smem:[#allocation15_spill]] }
  0xeb   : > { %p26_p9 = scmp.ge.s32.totalorder %s29_s14, 4   ;;  %s1407_s12 = sld [smem:[#allocation13_spill]] }
  0xec   : > { %s1408_s13 = sld [smem:[#allocation14_spill]]  ;;  %s1409_s30 = smov %s1076_s10 }
  0xed   : > { %s1410_s10 = smov %s1080_s11  ;;  %28 = sbr.rel (!%p26_p9) target bundleno = 12 (0xc), region = 125 }
  0xf0   : > { %s1411_s11 = smov %s1406_s1 }
  0xf2   :  { %680 = vsyncpa [#allocation3], 1 }
  0xf3   :  { %682 = vsyncpa [#allocation3 + $0x1], 1 }
  0xf4   :  { %683 = vsyncpa [#allocation4], 1 }
  0xf5   :  { %685 = vsyncpa [#allocation4 + $0x1], 1 }
  0xf6   :  { %686 = vsyncpa [#allocation7], 1 }
  0xf7   :  { %688 = vsyncpa [#allocation7 + $0x1], 1 }

</bundles_post_ra>
